<compile_context>
chip_gen: v7x
topology: tpu7x:2x2x1
jax: 0.10.0
libtpu: 0.0.40
codegen_flags: <defaults>
</compile_context>

<pallas_src>
import math

import jax
import jax.numpy as jnp
from jax.experimental import pallas as pl
from jax.experimental.pallas import tpu as pltpu

# ---------------- Module hyper-parameters (from Model.__init__ defaults) -----
SAMPLE_RATE = 16000
NUM_CHANNELS = 1                  # default -> mono='downmix' (identity for C==1)
MAX_SPEAKERS_PER_CHUNK = 4        # -> classes = ["speaker#1", ..., "speaker#4"]
MAX_SPEAKERS_PER_FRAME = 2        # -> powerset, MONO_LABEL_CLASSIFICATION
FRAME_SIZE = 160                  # 10 ms receptive field per frame (synthetic encoder)
CLASS_PAD = 128                   # lane-dense padded class dimension
NEG_BIG = -1e9                    # finite "minus infinity"; safe in f32 and bf16


def _num_powerset_classes(num_classes: int, max_set_size: int) -> int:
    return sum(math.comb(num_classes, k) for k in range(0, max_set_size + 1))


NUM_POWERSET = _num_powerset_classes(MAX_SPEAKERS_PER_CHUNK, MAX_SPEAKERS_PER_FRAME)  # 11


def _cdiv(a: int, b: int) -> int:
    return -(-a // b)


def _round_up(x: int, m: int) -> int:
    return _cdiv(x, m) * m


# ---------------- Kernel bodies ----------------------------------------------
def _log_softmax_head(frames, w, b):
    """frames (R,160) f32, w (160,128) f32, b (1,128) f32 -> log-probs (R,128) f32.

    Padded classes have zero weight columns and NEG_BIG bias, so they never win the
    row max and their exp underflows to 0: the softmax only sees the 11 real classes.
    """
    logits = jnp.dot(frames, w, preferred_element_type=jnp.float32) + b
    m = jnp.max(logits, axis=-1, keepdims=True)
    z = logits - m
    lse = jnp.log(jnp.sum(jnp.exp(z), axis=-1, keepdims=True))
    return z - lse


def _fused_head_kernel(x_ref, w_ref, b_ref, o_ref):
    """In-kernel framing: lane-dense (B, ft*160) sample tile -> (B*ft,160) frames."""
    B, ft_samples = x_ref.shape
    ft = ft_samples // FRAME_SIZE
    frames = x_ref[...].reshape(B * ft, FRAME_SIZE)           # on-chip relayout only
    logp = _log_softmax_head(frames, w_ref[...], b_ref[...])
    o_ref[...] = logp.reshape(B, ft, CLASS_PAD).astype(o_ref.dtype)


def _rows_head_kernel(fr_ref, w_ref, b_ref, o_ref):
    """Fallback kernel: frames pre-built in the wrapper as (tile, 160)."""
    o_ref[...] = _log_softmax_head(fr_ref[...], w_ref[...], b_ref[...]).astype(o_ref.dtype)


# ---------------- Tiling heuristics -------------------------------------------
def _choose_frame_tile(B: int, T: int, target_rows: int = 2048, min_steps: int = 2):
    """Frames per grid step (multiple of 16) and number of grid steps.

    * multiple of 16 keeps the output block (ft, 128) tile-aligned for f32 and bf16
      and makes the sample block width ft*160 a multiple of 128 (lane-dense DMA).
    * even split keeps tail padding small (vs. a fixed large tile).
    * >=2 steps when possible so "parallel" grid sharding can use both v7x TensorCores.
    * B*ft ~ target_rows keeps per-step VMEM ~5 MiB (fits v7x 32 MiB scoped default).
    """
    ft_cap = max(16, ((target_rows // max(B, 1)) // 16) * 16)
    n_steps = max(1, _cdiv(T, ft_cap))
    if n_steps < min_steps and T >= min_steps * 16:
        n_steps = min_steps
    ft = _round_up(_cdiv(T, n_steps), 16)
    n_steps = _cdiv(T, ft)
    return ft, n_steps


# ---------------- Forward paths ------------------------------------------------
def _forward_fused(mono, T, w_pad, b_pad, out_dtype):
    """mono (B, S) f32 -> (B, T_pad, CLASS_PAD) log-probs. Framing happens in-kernel."""
    B, S = mono.shape
    ft, n_steps = _choose_frame_tile(B, T)
    T_pad = ft * n_steps
    S_need = T_pad * FRAME_SIZE
    if S < S_need:
        # zero-pad tail so every grid step reads a full lane-dense sample block;
        # padded frames are sliced away by the caller.
        mono = jnp.pad(mono, ((0, 0), (0, S_need - S)))
    elif S > S_need:
        mono = mono[:, :S_need]   # drop trailing partial frame

    return pl.pallas_call(
        _fused_head_kernel,
        out_shape=jax.ShapeDtypeStruct((B, T_pad, CLASS_PAD), out_dtype),
        grid_spec=pltpu.PrefetchScalarGridSpec(
            num_scalar_prefetch=0,
            grid=(n_steps,),
            in_specs=[
                # lane-dense sample block: ft*160 is a multiple of 128
                pl.BlockSpec((B, ft * FRAME_SIZE), lambda j: (0, j)),
                pl.BlockSpec((FRAME_SIZE, CLASS_PAD), lambda j: (0, 0)),   # resident
                pl.BlockSpec((1, CLASS_PAD), lambda j: (0, 0)),            # resident
            ],
            out_specs=pl.BlockSpec((B, ft, CLASS_PAD), lambda j: (0, j, 0)),
        ),
        compiler_params=pltpu.CompilerParams(
            dimension_semantics=("parallel",),
        ),
    )(mono, w_pad, b_pad)


def _forward_fallback(mono, T, w_pad, b_pad, out_dtype):
    """Fallback: frame in the wrapper (extra HBM relayout pass), proven-working kernel."""
    B, S = mono.shape
    M = B * T
    frames = mono[:, : T * FRAME_SIZE].reshape(M, FRAME_SIZE)

    n_steps = max(1, _cdiv(M, 1024))
    if n_steps < 2 and M >= 32:
        n_steps = 2                      # v7x: give both TensorCores a step
    tile = _round_up(_cdiv(M, n_steps), 16)
    M_pad = _cdiv(M, tile) * tile
    if M_pad != M:
        frames = jnp.pad(frames, ((0, M_pad - M), (0, 0)))

    out = pl.pallas_call(
        _rows_head_kernel,
        out_shape=jax.ShapeDtypeStruct((M_pad, CLASS_PAD), out_dtype),
        grid_spec=pltpu.PrefetchScalarGridSpec(
            num_scalar_prefetch=0,
            grid=(M_pad // tile,),
            in_specs=[
                pl.BlockSpec((tile, FRAME_SIZE), lambda i: (i, 0)),
                pl.BlockSpec((FRAME_SIZE, CLASS_PAD), lambda i: (0, 0)),
                pl.BlockSpec((1, CLASS_PAD), lambda i: (0, 0)),
            ],
            out_specs=pl.BlockSpec((tile, CLASS_PAD), lambda i: (i, 0)),
        ),
        compiler_params=pltpu.CompilerParams(
            dimension_semantics=("parallel",),
        ),
    )(frames, w_pad, b_pad)
    return out[:M].reshape(B, T, CLASS_PAD)


# One-time probe: verify the in-kernel framing reshape lowers + computes correctly on
# this backend; otherwise fall back to wrapper framing.
_FUSED_OK = None


def _fused_framing_supported() -> bool:
    global _FUSED_OK
    if _FUSED_OK is None:
        try:
            B, T = 2, 8
            mono = jax.random.normal(jax.random.PRNGKey(123), (B, T * FRAME_SIZE), jnp.float32)
            w_real = jax.random.normal(
                jax.random.PRNGKey(7), (FRAME_SIZE, NUM_POWERSET), jnp.float32
            ) * (1.0 / math.sqrt(FRAME_SIZE))
            w = jnp.zeros((FRAME_SIZE, CLASS_PAD), jnp.float32).at[:, :NUM_POWERSET].set(w_real)
            b = jnp.full((1, CLASS_PAD), NEG_BIG, jnp.float32).at[:, :NUM_POWERSET].set(0.0)
            got = _forward_fused(mono, T, w, b, jnp.float32)[:, :T, :NUM_POWERSET]
            want = jax.nn.log_softmax(
                mono.reshape(B * T, FRAME_SIZE) @ w_real, axis=-1
            ).reshape(B, T, NUM_POWERSET)
            _FUSED_OK = bool(jnp.max(jnp.abs(got - want)) < 1e-3)
        except Exception:
            _FUSED_OK = False
    return _FUSED_OK


# ---------------- Public wrapper -----------------------------------------------
def prepare_params(weight, bias):
    """Precompute lane-dense padded parameters ONCE (not per forward call)."""
    w_pad = jnp.zeros((FRAME_SIZE, CLASS_PAD), jnp.float32)
    w_pad = w_pad.at[:, :NUM_POWERSET].set(weight.astype(jnp.float32))
    b_pad = jnp.full((1, CLASS_PAD), NEG_BIG, jnp.float32)
    b_pad = b_pad.at[:, :NUM_POWERSET].set(
        jnp.reshape(bias, (1, NUM_POWERSET)).astype(jnp.float32)
    )
    return w_pad, b_pad


def model_forward(waveforms, w_pad, b_pad, *, out_dtype=jnp.float32, slice_output=True):
    """Forward pass.

    waveforms : (batch, channels, num_samples)  -- PyTorch NCW audio layout.
    returns   : (batch, num_frames, 11) log-probabilities (Resolution.FRAME), or the
                raw padded (batch, num_frames_padded, 128) block if slice_output=False.
    """
    B, C, S = waveforms.shape
    waveforms = waveforms.astype(jnp.float32)

    if C == 1:
        # mono='downmix' with a single channel is an identity -> pure squeeze
        mono = waveforms[:, 0, :]
    else:
        # TODO(synk): module sets mono=None when num_channels > 1 (no downmix defined
        # by the abstract forward); average channels here as documented glue.
        mono = jnp.mean(waveforms, axis=1)

    T = S // FRAME_SIZE
    if T == 0:
        width = NUM_POWERSET if slice_output else CLASS_PAD
        return jnp.zeros((B, 0, width), out_dtype)

    if _fused_framing_supported():
        out = _forward_fused(mono, T, w_pad, b_pad, out_dtype)      # (B, T_pad, 128)
    else:
        out = _forward_fallback(mono, T, w_pad, b_pad, out_dtype)   # (B, T, 128)

    if slice_output:
        # TODO(synk): this slice is an extra HBM pass over the output; downstream
        # consumers can take slice_output=False (padded classes ~ NEG_BIG, exp()==0)
        # and fuse the [..., :11] slice into their first op.
        return out[:, :T, :NUM_POWERSET]
    return out


# ---------------- Deterministic parameter init + reference + smoke test --------
def init_params(key):
    kw, kb = jax.random.split(key)
    scale = 1.0 / math.sqrt(FRAME_SIZE)
    weight = jax.random.normal(kw, (FRAME_SIZE, NUM_POWERSET), jnp.float32) * scale
    bias = jax.random.normal(kb, (1, NUM_POWERSET), jnp.float32) * 0.01
    return weight, bias


def _reference(waveforms, weight, bias):
    B, C, S = waveforms.shape
    mono = jnp.mean(waveforms.astype(jnp.float32), axis=1)
    T = S // FRAME_SIZE
    frames = mono[:, : T * FRAME_SIZE].reshape(B * T, FRAME_SIZE)
    return jax.nn.log_softmax(frames @ weight + bias, axis=-1).reshape(B, T, NUM_POWERSET)


if __name__ == "__main__":
    key = jax.random.PRNGKey(0)
    k1, k2, k3, kp = jax.random.split(key, 4)
    weight, bias = init_params(kp)
    params = prepare_params(weight, bias)   # padded params built once, reused

    # case 1: (batch=2, channels=1, samples=1280) -> 8 frames, single grid step
    wav1 = jax.random.normal(k1, (2, NUM_CHANNELS, 1280), jnp.float32)
    out1 = jax.block_until_ready(model_forward(wav1, *params))
    assert out1.shape == (2, 1280 // FRAME_SIZE, NUM_POWERSET)
    assert bool(jnp.all(jnp.isfinite(out1)))
    assert bool(jnp.max(jnp.abs(jnp.exp(out1).sum(axis=-1) - 1.0)) < 1e-4)
    ref1 = _reference(wav1, weight, bias)
    assert bool(jnp.max(jnp.abs(out1 - ref1)) < 5e-4)

    # case 2: (3, 1, 1600) -> 10 frames: exercises frame-tile padding (T_pad = 16)
    wav2 = jax.random.normal(k2, (3, NUM_CHANNELS, 1600), jnp.float32)
    out2 = jax.block_until_ready(model_forward(wav2, *params))
    assert out2.shape == (3, 1600 // FRAME_SIZE, NUM_POWERSET)
    ref2 = _reference(wav2, weight, bias)
    assert bool(jnp.max(jnp.abs(out2 - ref2)) < 5e-4)

    # case 3: typical 5 s pyannote chunk (2, 1, 80000) -> 500 frames, multi-step grid
    wav3 = jax.random.normal(k3, (2, NUM_CHANNELS, 5 * SAMPLE_RATE), jnp.float32)
    out3 = jax.block_until_ready(model_forward(wav3, *params))
    assert out3.shape == (2, 500, NUM_POWERSET)
    ref3 = _reference(wav3, weight, bias)
    assert bool(jnp.max(jnp.abs(out3 - ref3)) < 5e-4)

    # bf16 output path (halves output HBM writes); math stays f32 inside the kernel
    out1_bf16 = jax.block_until_ready(
        model_forward(wav1, *params, out_dtype=jnp.bfloat16)
    )
    assert out1_bf16.dtype == jnp.bfloat16
    assert bool(jnp.max(jnp.abs(out1_bf16.astype(jnp.float32) - ref1)) < 5e-2)

    print("KERNEL_OK")
</pallas_src>

<mosaic_0001>
module attributes {stable_mosaic.version = 11 : i64} {
  func.func @_fused_head_kernel(%arg0: i32, %arg1: memref<2x2560xf32, #tpu.memory_space<vmem>>, %arg2: memref<160x128xf32, #tpu.memory_space<vmem>>, %arg3: memref<1x128xf32, #tpu.memory_space<vmem>>, %arg4: memref<2x16x128xf32, #tpu.memory_space<vmem>>) attributes {dimension_semantics = [#tpu.dimension_semantics<parallel>], iteration_bounds = array<i64: 1>, scalar_prefetch = 0 : i64, scratch_operands = 0 : i64, tpu.core_type = #tpu.core_type<tc>, window_params = [{transform_indices = @transform_0, window_bounds = array<i64: 2, 2560>}, {pipeline_mode = #tpu.pipeline_mode<synchronous>, transform_indices = @transform_1, window_bounds = array<i64: 160, 128>}, {pipeline_mode = #tpu.pipeline_mode<synchronous>, transform_indices = @transform_2, window_bounds = array<i64: 1, 128>}, {transform_indices = @transform_3, window_bounds = array<i64: 2, 16, 128>}]} {
    %c0 = arith.constant 0 : index
    %c0_0 = arith.constant 0 : index
    %0 = vector.load %arg1[%c0, %c0_0] : memref<2x2560xf32, #tpu.memory_space<vmem>>, vector<2x2560xf32>
    %1 = vector.shape_cast %0 : vector<2x2560xf32> to vector<32x160xf32>
    %c0_1 = arith.constant 0 : index
    %c0_2 = arith.constant 0 : index
    %2 = vector.load %arg2[%c0_1, %c0_2] : memref<160x128xf32, #tpu.memory_space<vmem>>, vector<160x128xf32>
    %c0_3 = arith.constant 0 : index
    %c0_4 = arith.constant 0 : index
    %3 = vector.load %arg3[%c0_3, %c0_4] : memref<1x128xf32, #tpu.memory_space<vmem>>, vector<1x128xf32>
    %cst = arith.constant dense<0.000000e+00> : vector<32x128xf32>
    %4 = tpu.matmul %1, %2, %cst {dimension_numbers = #tpu.dot_dimension_numbers<[1], [0], [0], [1], [0, 0, 1, 1], [], []>} : vector<32x160xf32>, vector<160x128xf32>, vector<32x128xf32> -> vector<32x128xf32>
    %5 = vector.broadcast %3 : vector<1x128xf32> to vector<32x128xf32>
    %6 = arith.addf %4, %5 : vector<32x128xf32>
    %cst_5 = arith.constant dense<0xFF800000> : vector<32xf32>
    %7 = vector.multi_reduction <maximumf>, %6, %cst_5 [1] : vector<32x128xf32> to vector<32xf32>
    %8 = vector.shape_cast %7 : vector<32xf32> to vector<32x1xf32>
    %9 = vector.broadcast %8 : vector<32x1xf32> to vector<32x128xf32>
    %10 = arith.subf %6, %9 : vector<32x128xf32>
    %11 = math.exp %10 : vector<32x128xf32>
    %cst_6 = arith.constant dense<0.000000e+00> : vector<32xf32>
    %12 = vector.multi_reduction <add>, %11, %cst_6 [1] : vector<32x128xf32> to vector<32xf32>
    %13 = vector.shape_cast %12 : vector<32xf32> to vector<32x1xf32>
    %14 = math.log %13 : vector<32x1xf32>
    %15 = vector.broadcast %14 : vector<32x1xf32> to vector<32x128xf32>
    %16 = arith.subf %10, %15 : vector<32x128xf32>
    %17 = vector.shape_cast %16 : vector<32x128xf32> to vector<2x16x128xf32>
    %c0_7 = arith.constant 0 : index
    %c0_8 = arith.constant 0 : index
    %c0_9 = arith.constant 0 : index
    %18 = vector.load %arg4[%c0_7, %c0_8, %c0_9] : memref<2x16x128xf32, #tpu.memory_space<vmem>>, vector<2x16x128xf32>
    tpu.vector_store %arg4[%c0_7, %c0_8, %c0_9], %17 {strides = array<i32>} : memref<2x16x128xf32, #tpu.memory_space<vmem>>, vector<2x16x128xf32>,
    return
  }
  func.func @transform_0(%arg0: i32) -> (i32, i32) {
    %c0_i32 = arith.constant 0 : i32
    %c0_i32_0 = arith.constant 0 : i32
    return %c0_i32, %arg0 : i32, i32
  }
  func.func @transform_1(%arg0: i32) -> (i32, i32) {
    %c0_i32 = arith.constant 0 : i32
    %c0_i32_0 = arith.constant 0 : i32
    %c0_i32_1 = arith.constant 0 : i32
    return %c0_i32, %c0_i32_0 : i32, i32
  }
  func.func @transform_2(%arg0: i32) -> (i32, i32) {
    %c0_i32 = arith.constant 0 : i32
    %c0_i32_0 = arith.constant 0 : i32
    %c0_i32_1 = arith.constant 0 : i32
    return %c0_i32, %c0_i32_0 : i32, i32
  }
  func.func @transform_3(%arg0: i32) -> (i32, i32, i32) {
    %c0_i32 = arith.constant 0 : i32
    %c0_i32_0 = arith.constant 0 : i32
    %c0_i32_1 = arith.constant 0 : i32
    return %c0_i32, %arg0, %c0_i32_0 : i32, i32, i32
  }
}

module attributes {stable_mosaic.version = 11 : i64} {
  func.func @_rows_head_kernel(%arg0: i32, %arg1: memref<16x160xf32, #tpu.memory_space<vmem>>, %arg2: memref<160x128xf32, #tpu.memory_space<vmem>>, %arg3: memref<1x128xf32, #tpu.memory_space<vmem>>, %arg4: memref<16x128xf32, #tpu.memory_space<vmem>>) attributes {dimension_semantics = [#tpu.dimension_semantics<parallel>], iteration_bounds = array<i64: 1>, scalar_prefetch = 0 : i64, scratch_operands = 0 : i64, tpu.core_type = #tpu.core_type<tc>, window_params = [{transform_indices = @transform_0, window_bounds = array<i64: 16, 160>}, {pipeline_mode = #tpu.pipeline_mode<synchronous>, transform_indices = @transform_1, window_bounds = array<i64: 160, 128>}, {pipeline_mode = #tpu.pipeline_mode<synchronous>, transform_indices = @transform_2, window_bounds = array<i64: 1, 128>}, {transform_indices = @transform_3, window_bounds = array<i64: 16, 128>}]} {
    %c0 = arith.constant 0 : index
    %c0_0 = arith.constant 0 : index
    %0 = vector.load %arg1[%c0, %c0_0] : memref<16x160xf32, #tpu.memory_space<vmem>>, vector<16x160xf32>
    %c0_1 = arith.constant 0 : index
    %c0_2 = arith.constant 0 : index
    %1 = vector.load %arg2[%c0_1, %c0_2] : memref<160x128xf32, #tpu.memory_space<vmem>>, vector<160x128xf32>
    %c0_3 = arith.constant 0 : index
    %c0_4 = arith.constant 0 : index
    %2 = vector.load %arg3[%c0_3, %c0_4] : memref<1x128xf32, #tpu.memory_space<vmem>>, vector<1x128xf32>
    %cst = arith.constant dense<0.000000e+00> : vector<16x128xf32>
    %3 = tpu.matmul %0, %1, %cst {dimension_numbers = #tpu.dot_dimension_numbers<[1], [0], [0], [1], [0, 0, 1, 1], [], []>} : vector<16x160xf32>, vector<160x128xf32>, vector<16x128xf32> -> vector<16x128xf32>
    %4 = vector.broadcast %2 : vector<1x128xf32> to vector<16x128xf32>
    %5 = arith.addf %3, %4 : vector<16x128xf32>
    %cst_5 = arith.constant dense<0xFF800000> : vector<16xf32>
    %6 = vector.multi_reduction <maximumf>, %5, %cst_5 [1] : vector<16x128xf32> to vector<16xf32>
    %7 = vector.shape_cast %6 : vector<16xf32> to vector<16x1xf32>
    %8 = vector.broadcast %7 : vector<16x1xf32> to vector<16x128xf32>
    %9 = arith.subf %5, %8 : vector<16x128xf32>
    %10 = math.exp %9 : vector<16x128xf32>
    %cst_6 = arith.constant dense<0.000000e+00> : vector<16xf32>
    %11 = vector.multi_reduction <add>, %10, %cst_6 [1] : vector<16x128xf32> to vector<16xf32>
    %12 = vector.shape_cast %11 : vector<16xf32> to vector<16x1xf32>
    %13 = math.log %12 : vector<16x1xf32>
    %14 = vector.broadcast %13 : vector<16x1xf32> to vector<16x128xf32>
    %15 = arith.subf %9, %14 : vector<16x128xf32>
    %c0_7 = arith.constant 0 : index
    %c0_8 = arith.constant 0 : index
    %16 = vector.load %arg4[%c0_7, %c0_8] : memref<16x128xf32, #tpu.memory_space<vmem>>, vector<16x128xf32>
    tpu.vector_store %arg4[%c0_7, %c0_8], %15 {strides = array<i32>} : memref<16x128xf32, #tpu.memory_space<vmem>>, vector<16x128xf32>,
    return
  }
  func.func @transform_0(%arg0: i32) -> (i32, i32) {
    %c0_i32 = arith.constant 0 : i32
    %c0_i32_0 = arith.constant 0 : i32
    return %arg0, %c0_i32 : i32, i32
  }
  func.func @transform_1(%arg0: i32) -> (i32, i32) {
    %c0_i32 = arith.constant 0 : i32
    %c0_i32_0 = arith.constant 0 : i32
    %c0_i32_1 = arith.constant 0 : i32
    return %c0_i32, %c0_i32_0 : i32, i32
  }
  func.func @transform_2(%arg0: i32) -> (i32, i32) {
    %c0_i32 = arith.constant 0 : i32
    %c0_i32_0 = arith.constant 0 : i32
    %c0_i32_1 = arith.constant 0 : i32
    return %c0_i32, %c0_i32_0 : i32, i32
  }
  func.func @transform_3(%arg0: i32) -> (i32, i32) {
    %c0_i32 = arith.constant 0 : i32
    %c0_i32_0 = arith.constant 0 : i32
    return %arg0, %c0_i32 : i32, i32
  }
}

</mosaic_0001>

<bundles_post_ra>
// kernel: tpu_custom_call.1
= control target key start
LH: loop header
LB: loop body
LE: loop exit
PB: predicated region body
PF: predicated region fallthrough
CT: control target
= control target key end

     0   :  { %8 = vsyncpa [#allocation3], 0  ;;  %s430_s0 = inlined_call_operand.hbm [shape: f32[16,160], index: 0, kind: input, shape index: {}]   ;;  %s431_s1 = inlined_call_operand.hbm [shape: f32[160,128], index: 1, kind: input, shape index: {}]   ;;  %s432_s2 = inlined_call_operand.vmem [shape: f32[1,128], index: 2, kind: input, shape index: {}]   ;;  %s433_s3 = inlined_call_operand.hbm [shape: f32[16,128], index: 3, kind: output, shape index: {}]  }
   0x1   :  { %9 = vsyncpa [#allocation6], 0 }
   0x2   :  { %10 = vsyncpa [#allocation4], 0  ;;  %s337_s12 = smov [#allocation2]   ;;  %s265_s16 = scalar_lea.hbm %s430_s0, 512 }
   0x3   :  { %s16_s13 = sshll.u32 %s337_s12, 4  ;;  %p266_p0 = scmp.ne.s32.totalorder %s430_s0, %s265_s16  ;;  %s17_s13 = int_to_ptr.vmem [resolvable:$true] %s16_s13 }
   0x4   :  { %p269_p1 = scmp.lt.u32.totalorder %s265_s16, %s430_s0 }
   0x6   :  { %p271_p2 = pnand %p269_p1, %p266_p0 }
   0x8   :  { %274 = shalt.err (!%p271_p2)
}
   0x9   :  { %s275_s21 = scalar_lea.vmem %s17_s13, 512  ;;  %p280_p4 = scmp.lt.s32.totalorder %s17_s13, %s17_s13 }
   0xa   :  { %p276_p3 = scmp.ne.s32.totalorder %s17_s13, %s275_s21  ;;  %p281_p5 = scmp.lt.s32.totalorder %s275_s21, %s275_s21 }
   0xc   :  { %p282_p6 = por %p281_p5, %p280_p4 }
   0xe   :  { %p283_p7 = pnand %p282_p6, %p276_p3 }
  0x10   :  { %286 = shalt.err (!%p283_p7)
}
  0x11   :  { %s338_s22 = smov 256   ;;  %s339_s23 = smov 16  }
  0x12   :  { %22 = dma.hbm_to_vmem [thread:$0]  %s430_s0, 512, %s17_s13, [#allocation3], %s338_s22, %s338_s22, %s339_s23  }
  0x13   :  { %s340_s26 = smov [#allocation5]   ;;  %s287_s30 = scalar_lea.hbm %s431_s1, 2560 }
  0x14   :  { %s28_s27 = sshll.u32 %s340_s26, 4  ;;  %p288_p8 = scmp.ne.s32.totalorder %s431_s1, %s287_s30  ;;  %s29_s27 = int_to_ptr.vmem [resolvable:$true] %s28_s27 }
  0x15   :  { %p291_p9 = scmp.lt.u32.totalorder %s287_s30, %s431_s1 }
  0x17   :  { %p293_p10 = pnand %p291_p9, %p288_p8 }
  0x19   :  { %296 = shalt.err (!%p293_p10)
}
  0x1a   :  { %s297_s8 = scalar_lea.vmem %s29_s27, 2560  ;;  %p302_p12 = scmp.lt.s32.totalorder %s29_s27, %s29_s27 }
  0x1b   :  { %p298_p11 = scmp.ne.s32.totalorder %s29_s27, %s297_s8  ;;  %p303_p13 = scmp.lt.s32.totalorder %s297_s8, %s297_s8 }
  0x1d   :  { %p304_p0 = por %p303_p13, %p302_p12 }
  0x1f   :  { %p305_p1 = pnand %p304_p0, %p298_p11 }
  0x21   :  { %308 = shalt.err (!%p305_p1)
}
  0x22   :  { %s341_s0 = smov 128   ;;  %s342_s9 = smov 8  }
  0x23   :  { %34 = dma.hbm_to_vmem [thread:$0]  %s431_s1, 2560, %s29_s27, [#allocation6], %s341_s0, %s341_s0, %s342_s9  }
  0x24   :  { %331 = dma.done.wait [#allocation3], 512  }
  0x25   :  { %332 = vsyncadd [#allocation3], 4294966784 }
  0x26   :  { %333 = dma.done.wait [#allocation6], 2560  }
  0x27   :  { %334 = vsyncadd [#allocation6], 4294964736  ;;  %v343_v0 = vmov 0.0|0.0   ;;  %v47_v1 = vld [vmem:[#allocation5] sm:$0xff]  ;;  %v48_v2 = vld [vmem:[#allocation5 + $0x8] sm:$0xff]  ;;  %vm74_vm0 = vcmask 261120  }
  0x28   :  { %199 = vmatprep.subr.bf16.mxu0 %v343_v0  ;;  %229 = vmatprep.subr.bf16.mxu1 %v343_v0  ;;  %v49_v3 = vld [vmem:[#allocation5 + $0x10] sm:$0xff]  ;;  %v200_v4 = vpack.c.bf16 %v48_v2, %v47_v1  ;;  %v50_v5 = vld [vmem:[#allocation5 + $0x18] sm:$0xff]  ;;  %v51_v7 = vld [vmem:[#allocation5 + $0x20] sm:$0xff] }
  0x29   :  { %v203_v6 = vpack.c.bf16 %v50_v5, %v49_v3  ;;  %v52_v8 = vld [vmem:[#allocation5 + $0x28] sm:$0xff]  ;;  %v46_v11 = vld [vmem:[#allocation2 + $0x18] sm:$0xff]  ;;  %v53_v12 = vld [vmem:[#allocation5 + $0x30] sm:$0xff] }
  0x2a   :  { %201 = vmatpush1.bf16.msra.mxu0 %v200_v4  ;;  %239 = vmatpush1.bf16.msra.mxu1 %v200_v4  ;;  %v44_v9 = vld [vmem:[#allocation2 + $0x8] sm:$0xff]  ;;  %v206_v10 = vpack.c.bf16 %v52_v8, %v51_v7  ;;  %v54_v13 = vld [vmem:[#allocation5 + $0x38] sm:$0xff]  ;;  %v55_v15 = vld [vmem:[#allocation5 + $0x40] sm:$0xff] }
  0x2b   :  { %202 = vmatprep.subr.bf16.mxu0 %v343_v0  ;;  %230 = vmatprep.subr.bf16.mxu1 %v343_v0  ;;  %v209_v14 = vpack.c.bf16 %v54_v13, %v53_v12  ;;  %v56_v16 = vld [vmem:[#allocation5 + $0x48] sm:$0xff]  ;;  %v57_v18 = vld [vmem:[#allocation5 + $0x50] sm:$0xff]  ;;  %v58_v19 = vld [vmem:[#allocation5 + $0x58] sm:$0xff] }
  0x2c   :  { %197 = vmatprep.mubr.msk.f32.mxu0 %vm74_vm0, %v44_v9  ;;  %198 = vmatprep.mubr.msk.f32.mxu1 %vm74_vm0, %v46_v11  ;;  %v212_v17 = vpack.c.bf16 %v56_v16, %v55_v15  ;;  %v215_v20 = vpack.c.bf16 %v58_v19, %v57_v18  ;;  %v59_v21 = vld [vmem:[#allocation5 + $0x60] sm:$0xff]  ;;  %v60_v22 = vld [vmem:[#allocation5 + $0x68] sm:$0xff]  ;;  %v61_v24 = vld [vmem:[#allocation5 + $0x70] sm:$0xff] }
  0x2d   :  { %v218_v23 = vpack.c.bf16 %v60_v22, %v59_v21  ;;  %v62_v25 = vld [vmem:[#allocation5 + $0x78] sm:$0xff]  ;;  %v63_v27 = vld [vmem:[#allocation5 + $0x80] sm:$0xff]  ;;  %v64_v28 = vld [vmem:[#allocation5 + $0x88] sm:$0xff] }
  0x2e   :  { %204 = vmatpush1.bf16.msra.mxu0 %v203_v6  ;;  %240 = vmatpush1.bf16.msra.mxu1 %v203_v6  ;;  %v221_v26 = vpack.c.bf16 %v62_v25, %v61_v24  ;;  %v224_v29 = vpack.c.bf16 %v64_v28, %v63_v27  ;;  %v65_v30 = vld [vmem:[#allocation5 + $0x90] sm:$0xff]  ;;  %v66_v31 = vld [vmem:[#allocation5 + $0x98] sm:$0xff]  ;;  %v43_v33 = vld [vmem:[#allocation2] sm:$0xff] }
  0x2f   :  { %205 = vmatprep.subr.bf16.mxu0 %v343_v0  ;;  %231 = vmatprep.subr.bf16.mxu1 %v343_v0  ;;  %v227_v32 = vpack.c.bf16 %v66_v31, %v65_v30  ;;  %v45_v34 = vld [vmem:[#allocation2 + $0x10] sm:$0xff]  ;;  %v196_v35 = vld [vmem:[%s432_s2] ss:$0 sm:$0xff]  ;;  %s344_s2 = smov [#allocation7]  }
  0x30   :  { %s183_s13 = sshll.u32 %s344_s2, 4  ;;  %s184_s13 = int_to_ptr.vmem [resolvable:$true] %s183_s13 }
  0x31   :  { %s309_s14 = scalar_lea.vmem %s184_s13, 256  ;;  %p314_p3 = scmp.lt.s32.totalorder %s184_s13, %s184_s13 }
  0x32   :  { %207 = vmatpush1.bf16.msra.mxu0 %v206_v10  ;;  %241 = vmatpush1.bf16.msra.mxu1 %v206_v10  ;;  %p310_p2 = scmp.ne.s32.totalorder %s184_s13, %s309_s14  ;;  %p315_p4 = scmp.lt.s32.totalorder %s309_s14, %s309_s14 }
  0x33   :  { %208 = vmatprep.subr.bf16.mxu0 %v343_v0  ;;  %232 = vmatprep.subr.bf16.mxu1 %v343_v0 }
  0x34   :  { %p316_p5 = por %p315_p4, %p314_p3 }
  0x36   :  { %210 = vmatpush1.bf16.msra.mxu0 %v209_v14  ;;  %242 = vmatpush1.bf16.msra.mxu1 %v209_v14  ;;  %p317_p6 = pnand %p316_p5, %p310_p2 }
  0x37   :  { %211 = vmatprep.subr.bf16.mxu0 %v343_v0  ;;  %233 = vmatprep.subr.bf16.mxu1 %v343_v0 }
  0x3a   :  { %213 = vmatpush1.bf16.msra.mxu0 %v212_v17  ;;  %243 = vmatpush1.bf16.msra.mxu1 %v212_v17 }
  0x3b   :  { %214 = vmatprep.subr.bf16.mxu0 %v343_v0  ;;  %234 = vmatprep.subr.bf16.mxu1 %v343_v0 }
  0x3e   :  { %216 = vmatpush1.bf16.msra.mxu0 %v215_v20  ;;  %244 = vmatpush1.bf16.msra.mxu1 %v215_v20 }
  0x3f   :  { %217 = vmatprep.subr.bf16.mxu0 %v343_v0  ;;  %235 = vmatprep.subr.bf16.mxu1 %v343_v0 }
  0x42   :  { %219 = vmatpush1.bf16.msra.mxu0 %v218_v23  ;;  %245 = vmatpush1.bf16.msra.mxu1 %v218_v23 }
  0x43   :  { %220 = vmatprep.subr.bf16.mxu0 %v343_v0  ;;  %236 = vmatprep.subr.bf16.mxu1 %v343_v0 }
  0x46   :  { %222 = vmatpush1.bf16.msra.mxu0 %v221_v26  ;;  %246 = vmatpush1.bf16.msra.mxu1 %v221_v26 }
  0x47   :  { %223 = vmatprep.subr.bf16.mxu0 %v343_v0  ;;  %237 = vmatprep.subr.bf16.mxu1 %v343_v0 }
  0x4a   :  { %225 = vmatpush1.bf16.msra.mxu0 %v224_v29  ;;  %247 = vmatpush1.bf16.msra.mxu1 %v224_v29 }
  0x4b   :  { %226 = vmatprep.subr.bf16.mxu0 %v343_v0  ;;  %238 = vmatprep.subr.bf16.mxu1 %v343_v0 }
  0x4e   :  { %228 = vmatpush1.bf16.msra.mxu0 %v227_v32  ;;  %248 = vmatpush1.bf16.msra.mxu1 %v227_v32 }
  0x51   :  { %146 = vmatmul.mubr.f32.vlgmr.msra.gmra.mrb[0].mxu0 %v43_v33  ;;  %151 = vmatmul.mubr.f32.vlgmr.msra.gmra.mrb[0].mxu1 %v45_v34 }
 0x124   :  { %v147_v36 = vpop.f32.mrb[0].mxu0  ;;  %v152_v37 = vpop.f32.mrb[0].mxu1 }
 0x125   :  { %v148_v38 = vadd.f32 %v196_v35, %v147_v36  ;;  %v149_v39 = vpop.f32.mrb[1].mxu0  ;;  %v154_v40 = vpop.f32.mrb[1].mxu1  ;;  %v153_v41 = vadd.f32 %v196_v35, %v152_v37 }
 0x127   :  { %156 = vmax.xlane.f32.xlu0 %v148_v38 }
 0x12b   :  { %158 = vmax.xlane.f32.xlu0 %v153_v41 }
 0x1b4   :  { %v157_v42 = vpop.xlane.xlu0 %156 }
 0x1b5   :  { %v160_v43 = vsub.f32 %v148_v38, %v157_v42 }
 0x1b7   :  { %v162_v44 = vmul.f32 1.442695, %v160_v43 }
 0x1b8   :  { %v159_v45 = vpop.xlane.xlu0 %158 }
 0x1b9   :  { %v161_v46 = vsub.f32 %v153_v41, %v159_v45  ;;  %257 = vpow2.f32 %v162_v44 }
 0x1bb   :  { %v164_v47 = vmul.f32 1.442695, %v161_v46 }
 0x1bd   :  { %259 = vpow2.f32 %v164_v47 }
 0x1c3   :  { %v258_v48 = vpop.eup %257 }
 0x1c4   :  { %166 = vadd.xlane.f32.xlu1 %v258_v48 }
 0x1c7   :  { %v260_v49 = vpop.eup %259 }
 0x1c8   :  { %168 = vadd.xlane.f32.xlu1 %v260_v49 }
 0x251   :  { %v167_v50 = vpop.xlane.xlu1 %166 }
 0x252   :  { %261 = vlog2.f32 %v167_v50 }
 0x255   :  { %v169_v51 = vpop.xlane.xlu1 %168 }
 0x256   :  { %263 = vlog2.f32 %v169_v51 }
 0x25c   :  { %v262_v52 = vpop.eup %261 }
 0x25d   :  { %v171_v53 = vmul.f32 0.6931472, %v262_v52 }
 0x25f   :  { %v174_v54 = vsub.f32 %v160_v43, %v171_v53 }
 0x260   :  { %v264_v55 = vpop.eup %263 }
 0x261   :  { %176 = vst [vmem:[#allocation7] sm:$0xff] %v174_v54  ;;  %v173_v56 = vmul.f32 0.6931472, %v264_v55 }
 0x263   :  { %v175_v57 = vsub.f32 %v161_v46, %v173_v56 }
 0x265   :  { %177 = vst [vmem:[#allocation7 + $0x8] sm:$0xff] %v175_v57 }
 0x266   :  { %320 = shalt.err (!%p317_p6)
}
 0x267   :  { %s321_s17 = scalar_lea.hbm %s433_s3, 256 }
 0x268   :  { %p322_p7 = scmp.ne.s32.totalorder %s433_s3, %s321_s17  ;;  %p325_p8 = scmp.lt.u32.totalorder %s321_s17, %s433_s3 }
 0x26a   :  { %p327_p9 = pnand %p325_p8, %p322_p7 }
 0x26c   :  { %330 = shalt.err (!%p327_p9)
}
 0x26d   :  { %189 = dma.vmem_to_hbm [thread:$0]  %s184_s13, 256, %s433_s3, [#allocation4], %s341_s0, %s341_s0, %s342_s9  }
 0x26e   :  { %335 = dma.done.wait [#allocation4], 256  }
 0x26f   :  { %336 = vsyncadd [#allocation4], 4294967040 }
 0x270   :  { %193 = vsyncpa [#allocation3], 1 }
 0x271   :  { %194 = vsyncpa [#allocation6], 1 }
 0x272   :  { %195 = vsyncpa [#allocation4], 1 }

</bundles_post_ra>
